<compile_context>
chip_gen: v6e
topology: v6e:2x2x1
jax: 0.10.0
libtpu: 0.0.40
codegen_flags: <defaults>
</compile_context>

<pallas_src>
import functools

import jax
import jax.numpy as jnp
from jax import lax
from jax.experimental import pallas as pl
from jax.experimental.pallas import tpu as pltpu


def _num_tensorcores():
    """Best-effort TensorCore count of the local chip (grid-splitting hint)."""
    try:
        kind = jax.devices()[0].device_kind.lower()
    except Exception:
        return 1
    # v7x has 2 TensorCores per chip; v4 / v5p split parallel grid axes across
    # 2 cores (megacore).  v5e / v6e are single-core: forcing extra grid steps
    # there only shrinks blocks and adds per-step overhead.
    if "v7" in kind or "v5p" in kind or kind.strip().endswith("v4"):
        return 2
    return 1


def _roll_lanes(x, shift, width):
    # Horizontal (lane-axis) shift.  pltpu.roll lowers to XLU lane rotates
    # (free filler under this kernel's DMA-bound roofline); its lowering is
    # only guaranteed-clean when the lane dim is a multiple of the 128-lane
    # vreg, so fall back to jnp.roll (slice+concat) for narrow images.
    if width % 128 == 0:
        return pltpu.roll(x, shift, axis=2)
    return jnp.roll(x, shift, axis=2)


def _nms_kernel(rel_ref, rep_ref, *rest, rel_thr, rep_thr, n_planes, height,
                width, pb, th, halo):
    if halo:
        top_ref, bot_ref, mask_ref, cnt_ref = rest
    else:
        mask_ref, cnt_ref = rest
        top_ref = bot_ref = None

    p = pl.program_id(0)      # plane-block index
    h = pl.program_id(1)      # row-tile index

    rep = rep_ref[...].astype(jnp.float32)        # (pb, th, W)
    rel = rel_ref[...].astype(jnp.float32)
    neg_inf = jnp.float32(-jnp.inf)

    # tiny 1-D iotas broadcast inside the selects (cheaper than full-plane
    # int32 index planes).
    lrow = lax.broadcasted_iota(jnp.int32, (1, th, 1), 1)            # local row
    grow = lrow + h * th                                             # global row
    gcol = lax.broadcasted_iota(jnp.int32, (1, 1, width), 2)         # global col
    gpln = lax.broadcasted_iota(jnp.int32, (pb, 1, 1), 0) + p * pb   # global plane

    # ---- vertical 3-max: rows i-1, i, i+1 (MaxPool2d pad rows -> -inf) ------
    up = jnp.roll(rep, 1, axis=1)        # row i <- rep[i-1]  (row 0 wraps)
    dn = jnp.roll(rep, -1, axis=1)       # row i <- rep[i+1]  (row th-1 wraps)
    if halo:
        # halo rows arrive as 8-row blocks; row 7 / row 0 are the needed rows.
        top = top_ref[:, 7:8, :].astype(jnp.float32)   # global row h*th - 1
        bot = bot_ref[:, 0:1, :].astype(jnp.float32)   # global row (h+1)*th
        up = jnp.where(lrow == 0, top, up)
        dn = jnp.where(lrow == th - 1, bot, dn)
    up = jnp.where(grow == 0, neg_inf, up)              # above the image
    dn = jnp.where(grow >= height - 1, neg_inf, dn)     # below image / ragged rows
    vert = jnp.maximum(jnp.maximum(up, rep), dn)

    # ---- horizontal 3-max ----------------------------------------------------
    lf = _roll_lanes(vert, 1, width)
    rt = _roll_lanes(vert, width - 1, width)
    lf = jnp.where(gcol == 0, neg_inf, lf)
    rt = jnp.where(gcol == width - 1, neg_inf, rt)
    pooled = jnp.maximum(jnp.maximum(lf, vert), rt)

    maxima = ((rep == pooled)
              & (rep >= jnp.float32(rep_thr))
              & (rel >= jnp.float32(rel_thr)))
    mask_ref[...] = maxima.astype(jnp.int8)

    # per-grid-block keypoint count; stale-VMEM rows/planes from ragged last
    # blocks are masked out so the count is exact.
    valid = (gpln < n_planes) & (grow < height)
    cnt = jnp.sum((maxima & valid).astype(jnp.int32))
    cnt_ref[...] = jnp.broadcast_to(cnt, cnt_ref.shape)


def nms_mask(reliability, repeatability, rel_thr=1.0, rep_thr=1.0, *,
             target_block_elems=1024 * 1024):
    """Local-maxima mask (int8 0/1, NCHW) + per-grid-block keypoint counts.

    Inputs may be float32 or bfloat16: the kernel upcasts to f32 internally,
    so feeding bf16 from the producing network halves the dominant read
    traffic.  Do NOT down-cast in a wrapper - that is an extra full HBM pass.
    """
    assert reliability.shape == repeatability.shape
    B, C, H, W = repeatability.shape
    P = B * C
    rel = reliability.reshape(P, H, W)
    rep = repeatability.reshape(P, H, W)

    num_tc = _num_tensorcores()
    plane = H * W

    # ---- tiling ---------------------------------------------------------------
    # Full-plane blocks when a ~target_block_elems block fits; otherwise tile H
    # in 32-row multiples (int8 output stays layout-legal) with 8-row halo
    # side-inputs so huge planes never have to be VMEM-resident in one piece.
    tiled_h = plane > target_block_elems and H > 32
    if tiled_h:
        pb = 1
        th = max(32, (target_block_elems // W) // 32 * 32)
    else:
        pb = max(1, min(P, target_block_elems // max(plane, 1)))
        if num_tc > 1 and P > 1:
            # only multi-TensorCore chips benefit from forcing >1 plane block
            pb = min(pb, pl.cdiv(P, num_tc))
            # best effort: make the block count a multiple of num_tc so no core
            # idles on the tail step (never shrink the block by more than 2x).
            for cand in range(pb, max(pb // 2, 1) - 1, -1):
                if pl.cdiv(P, cand) % num_tc == 0:
                    pb = cand
                    break
        th = H
    n_p = pl.cdiv(P, pb)
    n_h = pl.cdiv(H, th)
    # NOTE: P % pb != 0 / H % th != 0 is handled by Pallas' ragged last block
    # (no wrapper-side jnp.pad, so no extra full HBM rewrite of the inputs).

    kernel = functools.partial(
        _nms_kernel, rel_thr=float(rel_thr), rep_thr=float(rep_thr),
        n_planes=P, height=H, width=W, pb=pb, th=th, halo=tiled_h)

    main_spec = pl.BlockSpec((pb, th, W), lambda p, h: (p, h, 0))
    in_specs = [main_spec, main_spec]
    operands = [rel, rep]
    if tiled_h:
        thb = th // 8                      # tile height in 8-row halo blocks
        n8 = pl.cdiv(H, 8)
        in_specs += [
            # 8-row block whose LAST row is the row just above this tile
            pl.BlockSpec((pb, 8, W),
                         lambda p, h: (p, jnp.maximum(h * thb - 1, 0), 0)),
            # 8-row block whose FIRST row is the row just below this tile
            pl.BlockSpec((pb, 8, W),
                         lambda p, h: (p, jnp.minimum((h + 1) * thb, n8 - 1), 0)),
        ]
        operands += [rep, rep]

    out_shape = (
        jax.ShapeDtypeStruct((P, H, W), jnp.int8),
        # One (8,128) int32 tile per grid block is the cheapest layout-legal
        # way to return a per-block scalar (scalar-sized VMEM blocks break the
        # (8,128) tiling rule; a single resident SMEM output would be unsafe
        # under megacore grid splitting).  ~4 KiB/block of extra writes.
        jax.ShapeDtypeStruct((n_p, n_h, 8, 128), jnp.int32),
    )
    out_specs = (
        pl.BlockSpec((pb, th, W), lambda p, h: (p, h, 0)),
        pl.BlockSpec((1, 1, 8, 128), lambda p, h: (p, h, 0, 0)),
    )

    # VMEM limit sized from the actual double-buffered block footprint.
    blk = pb * th * W
    in_bytes = blk * (rel.dtype.itemsize + rep.dtype.itemsize)
    halo_bytes = 2 * pb * 8 * W * rep.dtype.itemsize if tiled_h else 0
    out_bytes = blk + 8 * 128 * 4                       # int8 mask + count tile
    need = 2 * (in_bytes + halo_bytes + out_bytes)      # double buffered
    vmem_limit = int(min(64 * 2**20, max(16 * 2**20, need * 3 // 2 + (2 << 20))))

    mask, counts = pl.pallas_call(
        kernel,
        out_shape=out_shape,
        grid=(n_p, n_h),
        in_specs=in_specs,
        out_specs=out_specs,
        compiler_params=pltpu.CompilerParams(
            dimension_semantics=("parallel", "parallel"),
            vmem_limit_bytes=vmem_limit),
    )(*operands)

    return mask.reshape(B, C, H, W), counts[:, :, 0, 0]


def non_max_suppression(reliability, repeatability, rel_thr=1.0, rep_thr=1.0):
    """Mirror of NonMaxSuppression.forward.

    reliability / repeatability: lists of length 1, each a (B, C, H, W) array.
    Returns a (2, N) int array with rows (y, x) of surviving maxima, in the
    same row-major order as torch's nonzero().
    """
    assert len(reliability) == len(repeatability) == 1
    rel, rep = reliability[0], repeatability[0]
    mask, counts = nms_mask(rel, rep, rel_thr=rel_thr, rep_thr=rep_thr)
    total = int(counts.sum())          # kernel-side count bounds the host scan
    if total == 0:
        return jnp.zeros((2, 0), dtype=jnp.int32)
    # TODO(synk): in-kernel coordinate compaction would remove this second pass.
    idx = jnp.stack(jnp.nonzero(mask != 0, size=total))   # (4, N): (b, c, y, x)
    return idx[2:4]                                       # (2, N): (y, x)


def _reference_mask(rel, rep, rel_thr, rep_thr):
    """Pure-JAX reference: MaxPool2d(3, stride=1, pad=1) via reduce_window."""
    pooled = lax.reduce_window(
        rep, -jnp.inf, lax.max,
        window_dimensions=(1, 1, 3, 3),
        window_strides=(1, 1, 1, 1),
        padding=((0, 0), (0, 0), (1, 1), (1, 1)))
    return (rep == pooled) & (rep >= rep_thr) & (rel >= rel_thr)


if __name__ == "__main__":
    root = jax.random.PRNGKey(0)
    rel_thr, rep_thr = 0.6, 0.6   # module defaults (1.0) would give empty output

    # (shape, target_block_elems or None=default).  Exercises: the un-tiled
    # path, ragged plane blocks, H-tiling with halos (W < 128 and W == 128,
    # i.e. both roll paths), and a ragged last H tile.
    cases = [
        ((2, 4, 16, 16), None),
        ((3, 1, 16, 16), 512),
        ((1, 2, 64, 64), 2048),
        ((1, 2, 64, 128), 4096),
        ((1, 1, 80, 128), 4096),
    ]
    for i, (shape, blk) in enumerate(cases):
        k1, k2 = jax.random.split(jax.random.fold_in(root, i))
        reliability = jax.random.uniform(k1, shape, dtype=jnp.float32)
        repeatability = jax.random.uniform(k2, shape, dtype=jnp.float32)
        kw = {} if blk is None else dict(target_block_elems=blk)
        mask, counts = nms_mask(reliability, repeatability,
                                rel_thr=rel_thr, rep_thr=rep_thr, **kw)
        jax.block_until_ready(mask)
        ref = _reference_mask(reliability, repeatability, rel_thr, rep_thr)
        assert jnp.array_equal(mask != 0, ref), f"mask mismatch for {shape}"
        assert int(counts.sum()) == int(ref.sum()), f"count mismatch for {shape}"

    # end-to-end coordinate check on the module-like demo shape
    k1, k2 = jax.random.split(jax.random.fold_in(root, 0))
    reliability = jax.random.uniform(k1, (2, 4, 16, 16), dtype=jnp.float32)
    repeatability = jax.random.uniform(k2, (2, 4, 16, 16), dtype=jnp.float32)
    coords = non_max_suppression([reliability], [repeatability],
                                 rel_thr=rel_thr, rep_thr=rep_thr)
    jax.block_until_ready(coords)
    ref = _reference_mask(reliability, repeatability, rel_thr, rep_thr)
    ref_coords = jnp.stack(jnp.nonzero(ref))[2:4]
    assert coords.shape[0] == 2
    assert jnp.array_equal(coords, ref_coords), "coordinate mismatch vs reference"

    # default thresholds (1.0) -> empty result via the kernel-side counts
    empty = non_max_suppression([reliability], [repeatability])
    assert empty.shape == (2, 0)

    print("KERNEL_OK")
</pallas_src>

<mosaic_0001>
module attributes {stable_mosaic.version = 11 : i64} {
  func.func @_nms_kernel(%arg0: i32, %arg1: i32, %arg2: memref<8x16x16xf32, #tpu.memory_space<vmem>>, %arg3: memref<8x16x16xf32, #tpu.memory_space<vmem>>, %arg4: memref<8x16x16xi8, #tpu.memory_space<vmem>>, %arg5: memref<1x1x8x128xi32, #tpu.memory_space<vmem>>) attributes {dimension_semantics = [#tpu.dimension_semantics<parallel>, #tpu.dimension_semantics<parallel>], iteration_bounds = array<i64: 1, 1>, scalar_prefetch = 0 : i64, scratch_operands = 0 : i64, tpu.core_type = #tpu.core_type<tc>, window_params = [{transform_indices = @transform_0, window_bounds = array<i64: 8, 16, 16>}, {transform_indices = @transform_1, window_bounds = array<i64: 8, 16, 16>}, {transform_indices = @transform_2, window_bounds = array<i64: 8, 16, 16>}, {transform_indices = @transform_3, window_bounds = array<i64: 1, 1, 8, 128>}]} {
    %c0 = arith.constant 0 : index
    %c0_0 = arith.constant 0 : index
    %c0_1 = arith.constant 0 : index
    %0 = vector.load %arg3[%c0, %c0_0, %c0_1] : memref<8x16x16xf32, #tpu.memory_space<vmem>>, vector<8x16x16xf32>
    %c0_2 = arith.constant 0 : index
    %c0_3 = arith.constant 0 : index
    %c0_4 = arith.constant 0 : index
    %1 = vector.load %arg2[%c0_2, %c0_3, %c0_4] : memref<8x16x16xf32, #tpu.memory_space<vmem>>, vector<8x16x16xf32>
    %2 = tpu.iota {dimensions = array<i32: 1>} : vector<1x16x1xi32>
    %c16_i32 = arith.constant 16 : i32
    %3 = arith.muli %arg1, %c16_i32 : i32
    %4 = vector.broadcast %3 : i32 to vector<1x16x1xi32>
    %5 = arith.addi %2, %4 : vector<1x16x1xi32>
    %6 = tpu.iota {dimensions = array<i32: 2>} : vector<1x1x16xi32>
    %7 = tpu.iota {dimensions = array<i32: 0>} : vector<8x1x1xi32>
    %c8_i32 = arith.constant 8 : i32
    %8 = arith.muli %arg0, %c8_i32 : i32
    %9 = vector.broadcast %8 : i32 to vector<8x1x1xi32>
    %10 = arith.addi %7, %9 : vector<8x1x1xi32>
    %11 = vector.extract_strided_slice %0 {offsets = [0, 15, 0], sizes = [8, 1, 16], strides = [1, 1, 1]} : vector<8x16x16xf32> to vector<8x1x16xf32>
    %12 = vector.extract_strided_slice %0 {offsets = [0, 0, 0], sizes = [8, 15, 16], strides = [1, 1, 1]} : vector<8x16x16xf32> to vector<8x15x16xf32>
    %13 = tpu.concatenate %11, %12 in 1 : vector<8x1x16xf32>, vector<8x15x16xf32> -> vector<8x16x16xf32>
    %14 = vector.extract_strided_slice %0 {offsets = [0, 1, 0], sizes = [8, 15, 16], strides = [1, 1, 1]} : vector<8x16x16xf32> to vector<8x15x16xf32>
    %15 = vector.extract_strided_slice %0 {offsets = [0, 0, 0], sizes = [8, 1, 16], strides = [1, 1, 1]} : vector<8x16x16xf32> to vector<8x1x16xf32>
    %16 = tpu.concatenate %14, %15 in 1 : vector<8x15x16xf32>, vector<8x1x16xf32> -> vector<8x16x16xf32>
    %c0_i32 = arith.constant 0 : i32
    %17 = vector.broadcast %c0_i32 : i32 to vector<1x16x1xi32>
    %18 = arith.cmpi eq, %5, %17 : vector<1x16x1xi32>
    %cst = arith.constant 0xFF800000 : f32
    %19 = vector.shape_cast %18 : vector<1x16x1xi1> to vector<1x16x1xi1>
    %20 = vector.broadcast %19 : vector<1x16x1xi1> to vector<8x16x16xi1>
    %21 = vector.broadcast %cst : f32 to vector<8x16x16xf32>
    %22 = arith.select %20, %21, %13 : vector<8x16x16xi1>, vector<8x16x16xf32>
    %c15_i32 = arith.constant 15 : i32
    %23 = vector.broadcast %c15_i32 : i32 to vector<1x16x1xi32>
    %24 = arith.cmpi sge, %5, %23 : vector<1x16x1xi32>
    %cst_5 = arith.constant 0xFF800000 : f32
    %25 = vector.shape_cast %24 : vector<1x16x1xi1> to vector<1x16x1xi1>
    %26 = vector.broadcast %25 : vector<1x16x1xi1> to vector<8x16x16xi1>
    %27 = vector.broadcast %cst_5 : f32 to vector<8x16x16xf32>
    %28 = arith.select %26, %27, %16 : vector<8x16x16xi1>, vector<8x16x16xf32>
    %29 = arith.maximumf %22, %0 : vector<8x16x16xf32>
    %30 = arith.maximumf %29, %28 : vector<8x16x16xf32>
    %31 = vector.extract_strided_slice %30 {offsets = [0, 0, 15], sizes = [8, 16, 1], strides = [1, 1, 1]} : vector<8x16x16xf32> to vector<8x16x1xf32>
    %32 = vector.extract_strided_slice %30 {offsets = [0, 0, 0], sizes = [8, 16, 15], strides = [1, 1, 1]} : vector<8x16x16xf32> to vector<8x16x15xf32>
    %33 = tpu.concatenate %31, %32 in 2 : vector<8x16x1xf32>, vector<8x16x15xf32> -> vector<8x16x16xf32>
    %34 = vector.extract_strided_slice %30 {offsets = [0, 0, 1], sizes = [8, 16, 15], strides = [1, 1, 1]} : vector<8x16x16xf32> to vector<8x16x15xf32>
    %35 = vector.extract_strided_slice %30 {offsets = [0, 0, 0], sizes = [8, 16, 1], strides = [1, 1, 1]} : vector<8x16x16xf32> to vector<8x16x1xf32>
    %36 = tpu.concatenate %34, %35 in 2 : vector<8x16x15xf32>, vector<8x16x1xf32> -> vector<8x16x16xf32>
    %c0_i32_6 = arith.constant 0 : i32
    %37 = vector.broadcast %c0_i32_6 : i32 to vector<1x1x16xi32>
    %38 = arith.cmpi eq, %6, %37 : vector<1x1x16xi32>
    %cst_7 = arith.constant 0xFF800000 : f32
    %39 = vector.shape_cast %38 : vector<1x1x16xi1> to vector<1x1x16xi1>
    %40 = vector.broadcast %39 : vector<1x1x16xi1> to vector<8x16x16xi1>
    %41 = vector.broadcast %cst_7 : f32 to vector<8x16x16xf32>
    %42 = arith.select %40, %41, %33 : vector<8x16x16xi1>, vector<8x16x16xf32>
    %c15_i32_8 = arith.constant 15 : i32
    %43 = vector.broadcast %c15_i32_8 : i32 to vector<1x1x16xi32>
    %44 = arith.cmpi eq, %6, %43 : vector<1x1x16xi32>
    %cst_9 = arith.constant 0xFF800000 : f32
    %45 = vector.shape_cast %44 : vector<1x1x16xi1> to vector<1x1x16xi1>
    %46 = vector.broadcast %45 : vector<1x1x16xi1> to vector<8x16x16xi1>
    %47 = vector.broadcast %cst_9 : f32 to vector<8x16x16xf32>
    %48 = arith.select %46, %47, %36 : vector<8x16x16xi1>, vector<8x16x16xf32>
    %49 = arith.maximumf %42, %30 : vector<8x16x16xf32>
    %50 = arith.maximumf %49, %48 : vector<8x16x16xf32>
    %51 = arith.cmpf oeq, %0, %50 : vector<8x16x16xf32>
    %cst_10 = arith.constant 6.000000e-01 : f32
    %52 = vector.broadcast %cst_10 : f32 to vector<8x16x16xf32>
    %53 = arith.cmpf oge, %0, %52 : vector<8x16x16xf32>
    %54 = arith.andi %51, %53 : vector<8x16x16xi1>
    %cst_11 = arith.constant 6.000000e-01 : f32
    %55 = vector.broadcast %cst_11 : f32 to vector<8x16x16xf32>
    %56 = arith.cmpf oge, %1, %55 : vector<8x16x16xf32>
    %57 = arith.andi %54, %56 : vector<8x16x16xi1>
    %58 = arith.extui %57 : vector<8x16x16xi1> to vector<8x16x16xi8>
    %c0_12 = arith.constant 0 : index
    %c0_13 = arith.constant 0 : index
    %c0_14 = arith.constant 0 : index
    %59 = vector.load %arg4[%c0_12, %c0_13, %c0_14] : memref<8x16x16xi8, #tpu.memory_space<vmem>>, vector<8x16x16xi8>
    tpu.vector_store %arg4[%c0_12, %c0_13, %c0_14], %58 {strides = array<i32>} : memref<8x16x16xi8, #tpu.memory_space<vmem>>, vector<8x16x16xi8>,
    %c8_i32_15 = arith.constant 8 : i32
    %60 = vector.broadcast %c8_i32_15 : i32 to vector<8x1x1xi32>
    %61 = arith.cmpi slt, %10, %60 : vector<8x1x1xi32>
    %c16_i32_16 = arith.constant 16 : i32
    %62 = vector.broadcast %c16_i32_16 : i32 to vector<1x16x1xi32>
    %63 = arith.cmpi slt, %5, %62 : vector<1x16x1xi32>
    %64 = vector.broadcast %61 : vector<8x1x1xi1> to vector<8x16x1xi1>
    %65 = vector.broadcast %63 : vector<1x16x1xi1> to vector<8x16x1xi1>
    %66 = arith.andi %64, %65 : vector<8x16x1xi1>
    %67 = vector.broadcast %66 : vector<8x16x1xi1> to vector<8x16x16xi1>
    %68 = arith.andi %57, %67 : vector<8x16x16xi1>
    %69 = arith.extui %68 : vector<8x16x16xi1> to vector<8x16x16xi32>
    %70 = vector.shape_cast %69 : vector<8x16x16xi32> to vector<1x8x16x16xi32>
    %cst_17 = arith.constant dense<0> : vector<1xi32>
    %71 = vector.multi_reduction <add>, %70, %cst_17 [1, 2, 3] : vector<1x8x16x16xi32> to vector<1xi32>
    %72 = vector.shape_cast %71 : vector<1xi32> to vector<1x1x1x1xi32>
    %73 = vector.extract %72[0, 0, 0, 0] : i32 from vector<1x1x1x1xi32>
    %74 = vector.broadcast %73 : i32 to vector<1x1x8x128xi32>
    %c0_18 = arith.constant 0 : index
    %c0_19 = arith.constant 0 : index
    %c0_20 = arith.constant 0 : index
    %c0_21 = arith.constant 0 : index
    %75 = vector.load %arg5[%c0_18, %c0_19, %c0_20, %c0_21] : memref<1x1x8x128xi32, #tpu.memory_space<vmem>>, vector<1x1x8x128xi32>
    tpu.vector_store %arg5[%c0_18, %c0_19, %c0_20, %c0_21], %74 {strides = array<i32>} : memref<1x1x8x128xi32, #tpu.memory_space<vmem>>, vector<1x1x8x128xi32>,
    return
  }
  func.func @transform_0(%arg0: i32, %arg1: i32) -> (i32, i32, i32) {
    %c0_i32 = arith.constant 0 : i32
    %c0_i32_0 = arith.constant 0 : i32
    return %arg0, %arg1, %c0_i32 : i32, i32, i32
  }
  func.func @transform_1(%arg0: i32, %arg1: i32) -> (i32, i32, i32) {
    %c0_i32 = arith.constant 0 : i32
    %c0_i32_0 = arith.constant 0 : i32
    return %arg0, %arg1, %c0_i32 : i32, i32, i32
  }
  func.func @transform_2(%arg0: i32, %arg1: i32) -> (i32, i32, i32) {
    %c0_i32 = arith.constant 0 : i32
    %c0_i32_0 = arith.constant 0 : i32
    return %arg0, %arg1, %c0_i32 : i32, i32, i32
  }
  func.func @transform_3(%arg0: i32, %arg1: i32) -> (i32, i32, i32, i32) {
    %c0_i32 = arith.constant 0 : i32
    %c0_i32_0 = arith.constant 0 : i32
    %c0_i32_1 = arith.constant 0 : i32
    return %arg0, %arg1, %c0_i32, %c0_i32_0 : i32, i32, i32, i32
  }
}

</mosaic_0001>

<bundles_post_ra>
// kernel: tpu_custom_call.1
= control target key start
LH: loop header
LB: loop body
LE: loop exit
PB: predicated region body
PF: predicated region fallthrough
CT: control target
= control target key end

     0   :  { %9 = vsyncpa [#allocation3], 0  ;;  %s1816_s0 = inlined_call_operand.hbm [shape: f32[8,16,16], index: 0, kind: input, shape index: {}]   ;;  %s1817_s1 = inlined_call_operand.hbm [shape: f32[8,16,16], index: 1, kind: input, shape index: {}]   ;;  %s1818_s2 = inlined_call_operand.hbm [shape: s8[8,16,16], index: 2, kind: output, shape index: {0}]   ;;  %s1819_s3 = inlined_call_operand.hbm [shape: s32[1,1,8,128], index: 3, kind: output, shape index: {1}]  }
   0x1   :  { %10 = vsyncpa [#allocation6], 0 }
   0x2   :  { %11 = vsyncpa [#allocation4], 0 }
   0x3   :  { %12 = vsyncpa [#allocation9], 0  ;;  %s1080_s12 = smov [#allocation2]  }
   0x4   :  { %s18_s13 = sshll.u32 %s1080_s12, 4  ;;  %s19_s13 = int_to_ptr.vmem [resolvable:$true] %s18_s13 }
   0x5   :  { %s1000_s14 = scalar_lea.vmem %s19_s13, 2048  ;;  %p1005_p1 = scmp.lt.s32.totalorder %s19_s13, %s19_s13 }
   0x6   :  { %p1001_p0 = scmp.ne.s32.totalorder %s19_s13, %s1000_s14  ;;  %p1006_p2 = scmp.lt.s32.totalorder %s1000_s14, %s1000_s14 }
   0x8   :  { %p1007_p3 = por %p1006_p2, %p1005_p1 }
   0xa   :  { %p1008_p4 = pnand %p1007_p3, %p1001_p0 }
   0xc   :  { %1011 = shalt.err (!%p1008_p4)
}
   0xd   :  { %s1081_s15 = smov 128   ;;  %s1082_s16 = smov 8  }
   0xe   :  { %24 = dma.hbm_to_vmem [thread:$0]  %s1816_s0, 2048, %s19_s13, [#allocation3], %s1081_s15, %s1081_s15, %s1082_s16  }
   0xf   :  { %s1083_s19 = smov [#allocation5]  }
  0x10   :  { %s30_s20 = sshll.u32 %s1083_s19, 4  ;;  %s31_s20 = int_to_ptr.vmem [resolvable:$true] %s30_s20 }
  0x11   :  { %s1020_s21 = scalar_lea.vmem %s31_s20, 2048  ;;  %p1025_p6 = scmp.lt.s32.totalorder %s31_s20, %s31_s20 }
  0x12   :  { %p1021_p5 = scmp.ne.s32.totalorder %s31_s20, %s1020_s21  ;;  %p1026_p7 = scmp.lt.s32.totalorder %s1020_s21, %s1020_s21 }
  0x14   :  { %p1027_p8 = por %p1026_p7, %p1025_p6 }
  0x16   :  { %p1028_p9 = pnand %p1027_p8, %p1021_p5 }
  0x18   :  { %1031 = shalt.err (!%p1028_p9)
}
  0x19   :  { %36 = dma.hbm_to_vmem [thread:$0]  %s1817_s1, 2048, %s31_s20, [#allocation6], %s1081_s15, %s1081_s15, %s1082_s16  }
  0x1a   :  { %1072 = dma.done.wait [#allocation3], 2048  }
  0x1b   :  { %1073 = vsyncadd [#allocation3], 4294965248 }
  0x1c   :  { %1074 = dma.done.wait [#allocation6], 2048  }
  0x1d   :  { %1075 = vsyncadd [#allocation6], 4294965248  ;;  %v77_v0 = vlaneseq  ;;  %vm127_vm0 = vcmask 1040384   ;;  %v1125_v3 = vld [vmem:[#allocation5 + $0x10] sm:$0xff]  ;;  %v1127_v4 = vld [vmem:[#allocation5 + $0x18] sm:$0xff]  ;;  %vm168_vm1 = vcmask 1046528  }
  0x1e   :  { %v1130_v5 = vld [vmem:[#allocation5] sm:$0xff]  ;;  %v104_v6 = vrot.slane %v1127_v4, 7  ;;  %v130_v7 = vrot.slane %v1125_v3, 7  ;;  %v172_v8 = vrot.slane %v1125_v3, 1  ;;  %v173_v9 = vrot.slane %v1127_v4, 1  ;;  %v1137_v10 = vld [vmem:[#allocation5 + $0x8] sm:$0xff] }
  0x1f   :  { %v1120_v1 = vshrl.u32 %v77_v0, 7  ;;  %v1139_v11 = vld [vmem:[#allocation5 + $0x20] sm:$0xff]  ;;  %v103_v12 = vrot.slane %v1137_v10, 7  ;;  %v128_v13 = vrot.slane %v1130_v5, 7  ;;  %v169_v14 = vrot.slane %v1130_v5, 1  ;;  %v1145_v16 = vld [vmem:[#allocation5 + $0x28] sm:$0xff] }
  0x20   :  { %v170_v15 = vrot.slane %v1137_v10, 1  ;;  %v131_v17 = vsel %vm127_vm0, %v130_v7, %v104_v6  ;;  %v218_v18 = vsel %vm168_vm1, %v173_v9, %v172_v8  ;;  %v105_v19 = vrot.slane %v1145_v16, 7  ;;  %v1160_v25 = vld [vmem:[#allocation5 + $0x38] sm:$0xff]  ;;  %v1167_v30 = vld [vmem:[#allocation5 + $0x30] sm:$0xff]  ;;  %s1084_s0 = smov 113   ;;  %s1085_s1 = smov 1  }
  0x21   :  { %v1123_v2 = vadd.s32 8, %v1120_v1  ;;  %vm225_vm3 = vcmp.eq.s32.totalorder %v1120_v1, 0  ;;  %v132_v20 = vrot.slane %v1139_v11, 7  ;;  %v272_v22 = vmax.f32 %v131_v17, %v1127_v4  ;;  %v1241_v17 = vld [vmem:[#allocation5 + $0x78] sm:$0xff]  ;;  %s1086_s24 = smov 127   ;;  %s1087_s25 = smov 15  }
  0x22   :  { %v129_v23 = vsel %vm127_vm0, %v128_v13, %v103_v12  ;;  %v217_v24 = vsel %vm168_vm1, %v170_v15, %v169_v14  ;;  %v175_v29 = vrot.slane %v1139_v11, 1  ;;  %v176_v32 = vrot.slane %v1145_v16, 1  ;;  %s1089_s26 = smov [#allocation7]  }
  0x23   :  { %vm248_vm2 = vcmp.ge.s32.totalorder %v1123_v2, 15  ;;  %v270_v27 = vmax.f32 %v129_v23, %v1137_v10  ;;  %v133_v28 = vsel %vm127_vm0, %v132_v20, %v105_v19  ;;  %v160_v34 = vsel %vm127_vm0, %v103_v12, %v128_v13  ;;  %v1233_v12 = vld [vmem:[#allocation5 + $0x68] sm:$0xff]  ;;  %v1235_v13 = vld [vmem:[#allocation5 + $0x40] sm:$0xff]  ;;  %s950_s27 = sshll.u32 %s1089_s26, 4  ;;  %s951_s27 = int_to_ptr.vmem [resolvable:$true] %s950_s27 }
  0x24   :  { %v256_v21 = vsel %vm248_vm2, -inf, %v218_v18  ;;  %v254_v26 = vsel %vm248_vm2, -inf, %v217_v24  ;;  %v274_v33 = vmax.f32 %v133_v28, %v1145_v16  ;;  %v171_v36 = vsel %vm168_vm1, %v169_v14, %v170_v15  ;;  %v1237_v14 = vld [vmem:[#allocation5 + $0x48] sm:$0xff]  ;;  %v1239_v15 = vld [vmem:[#allocation5 + $0x60] sm:$0xff]  ;;  %s1032_s28 = scalar_lea.vmem %s951_s27, 512  ;;  %p1037_p11 = scmp.lt.s32.totalorder %s951_s27, %s951_s27 }
  0x25   :  { %v1169_v31 = vmax.f32 %v272_v22, %v256_v21  ;;  %v1174_v35 = vmax.f32 %v270_v27, %v254_v26  ;;  %v231_v37 = vsel %vm225_vm3, -inf, %v160_v34  ;;  %v106_v38 = vrot.slane %v1160_v25, 7  ;;  %p1033_p10 = scmp.ne.s32.totalorder %s951_s27, %s1032_s28  ;;  %p1038_p12 = scmp.lt.s32.totalorder %s1032_s28, %s1032_s28 }
  0x26   :  { %v219_v39 = vsel %vm168_vm1, %v176_v32, %v175_v29  ;;  %v269_v40 = vmax.f32 %v231_v37, %v1130_v5  ;;  %v134_v41 = vrot.slane %v1167_v30, 7  ;;  %v178_v42 = vrot.slane %v1167_v30, 1 }
  0x27   :  { %323 = vrot.lane.b32.xlu1 %v1169_v31, %s1084_s0  ;;  %319 = vrot.lane.b32.xlu0 %v1174_v35, %s1084_s0  ;;  %v258_v43 = vsel %vm248_vm2, -inf, %v219_v39  ;;  %v179_v44 = vrot.slane %v1160_v25, 1  ;;  %v162_v45 = vsel %vm127_vm0, %v105_v19, %v132_v20  ;;  %v177_v46 = vsel %vm168_vm1, %v175_v29, %v176_v32  ;;  %v1247_v19 = vld [vmem:[#allocation5 + $0x58] sm:$0xff]  ;;  %p1039_p13 = por %p1038_p12, %p1037_p11 }
  0x28   :  { %v1193_v47 = vmax.f32 %v274_v33, %v258_v43  ;;  %v1195_v48 = vmax.f32 %v269_v40, %v171_v36  ;;  %v135_v49 = vsel %vm127_vm0, %v134_v41, %v106_v38  ;;  %v235_v50 = vsel %vm225_vm3, -inf, %v162_v45  ;;  %v1268_v36 = vld [vmem:[#allocation5 + $0x50] sm:$0xff] }
  0x29   :  { %v220_v51 = vsel %vm168_vm1, %v179_v44, %v178_v42  ;;  %v276_v52 = vmax.f32 %v135_v49, %v1160_v25  ;;  %v273_v53 = vmax.f32 %v235_v50, %v1139_v11  ;;  %v163_v54 = vsel %vm127_vm0, %v106_v38, %v134_v41  ;;  %p1040_p0 = pnand %p1039_p13, %p1033_p10 }
  0x2a   :  { %v260_v55 = vsel %vm248_vm2, -inf, %v220_v51  ;;  %v237_v56 = vsel %vm225_vm3, -inf, %v163_v54  ;;  %v161_v57 = vsel %vm127_vm0, %v104_v6, %v130_v7  ;;  %v180_v61 = vsel %vm168_vm1, %v178_v42, %v179_v44 }
  0x2b   :  { %327 = vrot.lane.b32.xlu1 %v1193_v47, %s1084_s0  ;;  %317 = vrot.lane.b32.xlu0 %v1195_v48, %s1084_s0  ;;  %v1213_v58 = vmax.f32 %v276_v52, %v260_v55  ;;  %v1215_v59 = vmax.f32 %v273_v53, %v177_v46  ;;  %v275_v60 = vmax.f32 %v237_v56, %v1167_v30  ;;  %v233_v62 = vsel %vm225_vm3, -inf, %v161_v57 }
  0x2c   :  { %v271_v63 = vmax.f32 %v233_v62, %v1125_v3  ;;  %v174_v7 = vsel %vm168_vm1, %v172_v8, %v173_v9  ;;  %v109_v8 = vrot.slane %v1233_v12, 7  ;;  %v1250_v9 = vld [vmem:[#allocation5 + $0x70] sm:$0xff]  ;;  %v107_v20 = vrot.slane %v1237_v14, 7 }
  0x2d   :  { %v1226_v6 = vmax.f32 %v275_v60, %v180_v61  ;;  %1824 = vst [vmem:[#allocation14_spill] sm:$0xff] %v1250_v9  ;;  %v136_v21 = vrot.slane %v1235_v13, 7  ;;  %v181_v22 = vrot.slane %v1235_v13, 1  ;;  %v140_v23 = vrot.slane %v1239_v15, 7 }
  0x2e   :  { %v1245_v18 = vmax.f32 %v271_v63, %v174_v7  ;;  %v182_v24 = vrot.slane %v1237_v14, 1  ;;  %v187_v26 = vrot.slane %v1239_v15, 1  ;;  %v188_v27 = vrot.slane %v1233_v12, 1 }
  0x2f   :  { %331 = vrot.lane.b32.xlu1 %v1213_v58, %s1084_s0  ;;  %325 = vrot.lane.b32.xlu0 %v1215_v59, %s1084_s0  ;;  %v110_v28 = vrot.slane %v1241_v17, 7  ;;  %v108_v29 = vrot.slane %v1247_v19, 7  ;;  %v141_v32 = vsel %vm127_vm0, %v140_v23, %v109_v8  ;;  %v166_v33 = vsel %vm127_vm0, %v109_v8, %v140_v23 }
  0x30   :  { %v142_v34 = vrot.slane %v1250_v9, 7  ;;  %v223_v37 = vsel %vm168_vm1, %v188_v27, %v187_v26  ;;  %v282_v38 = vmax.f32 %v141_v32, %v1233_v12  ;;  %v189_v39 = vsel %vm168_vm1, %v187_v26, %v188_v27 }
  0x31   :  { %v243_v40 = vsel %vm225_vm3, -inf, %v166_v33  ;;  %v266_v41 = vsel %vm248_vm2, -inf, %v223_v37  ;;  %v190_v44 = vrot.slane %v1250_v9, 1  ;;  %v191_v46 = vrot.slane %v1241_v17, 1 }
  0x32   :  { %v281_v42 = vmax.f32 %v243_v40, %v1239_v15  ;;  %v143_v43 = vsel %vm127_vm0, %v142_v34, %v110_v28  ;;  %v1282_v45 = vmax.f32 %v282_v38, %v266_v41  ;;  %v167_v50 = vsel %vm127_vm0, %v110_v28, %v142_v34 }
  0x33   :  { %367 = vrot.lane.b32.xlu1 %v1174_v35, %s1085_s1  ;;  %329 = vrot.lane.b32.xlu0 %v1226_v6, %s1084_s0  ;;  %v284_v49 = vmax.f32 %v143_v43, %v1241_v17  ;;  %v164_v51 = vsel %vm127_vm0, %v107_v20, %v136_v21  ;;  %v138_v52 = vrot.slane %v1268_v36, 7  ;;  %v245_v54 = vsel %vm225_vm3, -inf, %v167_v50 }
  0x34   :  { %v1289_v53 = vmax.f32 %v281_v42, %v189_v39  ;;  %v224_v55 = vsel %vm168_vm1, %v191_v46, %v190_v44  ;;  %v192_v56 = vsel %vm168_vm1, %v190_v44, %v191_v46  ;;  %v283_v57 = vmax.f32 %v245_v54, %v1250_v9 }
  0x35   :  { %v137_v60 = vsel %vm127_vm0, %v136_v21, %v107_v20  ;;  %v221_v61 = vsel %vm168_vm1, %v182_v24, %v181_v22  ;;  %v184_v62 = vrot.slane %v1268_v36, 1  ;;  %v268_v63 = vsel %vm248_vm2, -inf, %v224_v55 }
  0x36   :  { %v239_v7 = vsel %vm225_vm3, -inf, %v164_v51  ;;  %v185_v8 = vrot.slane %v1247_v19, 1  ;;  %v1308_v23 = vmax.f32 %v284_v49, %v268_v63  ;;  %v1310_v26 = vmax.f32 %v283_v57, %v192_v56 }
  0x37   :  { %321 = vrot.lane.b32.xlu1 %v1245_v18, %s1084_s0  ;;  %365 = vrot.lane.b32.xlu0 %v1195_v48, %s1085_s1  ;;  %v165_v27 = vsel %vm127_vm0, %v108_v29, %v138_v52  ;;  %v278_v20 = vmax.f32 %v137_v60, %v1237_v14  ;;  %v262_v21 = vsel %vm248_vm2, -inf, %v221_v61  ;;  %v277_v28 = vmax.f32 %v239_v7, %v1235_v13 }
  0x38   :  { %v139_v32 = vsel %vm127_vm0, %v138_v52, %v108_v29  ;;  %v183_v33 = vsel %vm168_vm1, %v181_v22, %v182_v24  ;;  %v222_v34 = vsel %vm168_vm1, %v185_v8, %v184_v62  ;;  %v241_v37 = vsel %vm225_vm3, -inf, %v165_v27 }
  0x39   :  { %v1328_v38 = vmax.f32 %v278_v20, %v262_v21  ;;  %v280_v39 = vmax.f32 %v139_v32, %v1247_v19  ;;  %v1333_v40 = vmax.f32 %v277_v28, %v183_v33  ;;  %v264_v22 = vsel %vm248_vm2, -inf, %v222_v34 }
  0x3a   :  { %v279_v24 = vmax.f32 %v241_v37, %v1268_v36  ;;  %v186_v1 = vsel %vm168_vm1, %v184_v62, %v185_v8  ;;  %v1440_v54 = vand.u32 127, %v77_v0  ;;  %vm1823_vm4 = vcmask 7168  }
  0x3b   :  { %371 = vrot.lane.b32.xlu1 %v1169_v31, %s1085_s1  ;;  %369 = vrot.lane.b32.xlu0 %v1245_v18, %s1085_s1  ;;  %v1341_v29 = vmax.f32 %v280_v39, %v264_v22  ;;  %vm526_vm6 = vcmask 121856   ;;  %vm630_vm8 = vcmp.ge.f32.partialorder %v1137_v10, 0.6  ;;  %vm892_vm10 = vcmask 130048  }
  0x3c   :  { %v1345_v41 = vmax.f32 %v279_v24, %v186_v1  ;;  %vm1822_vm5 = vcmp.eq.s32.totalorder %v1440_v54, 0  ;;  %vm562_vm7 = vcmp.eq.s32.totalorder %v1440_v54, 15  ;;  %vm629_vm11 = vcmp.ge.f32.partialorder %v1130_v5, 0.6 }
  0x3d   :  { %vm632_vm14 = vcmp.ge.f32.partialorder %v1127_v4, 0.6  ;;  %vm631_vm3 = vcmp.ge.f32.partialorder %v1125_v3, 0.6 }
  0x3f   :  { %375 = vrot.lane.b32.xlu1 %v1193_v47, %s1085_s1  ;;  %373 = vrot.lane.b32.xlu0 %v1215_v59, %s1085_s1 }
  0x43   :  { %379 = vrot.lane.b32.xlu1 %v1213_v58, %s1085_s1  ;;  %377 = vrot.lane.b32.xlu0 %v1226_v6, %s1085_s1 }
  0x47   :  { %335 = vrot.lane.b32.xlu1 %v1328_v38, %s1084_s0  ;;  %333 = vrot.lane.b32.xlu0 %v1333_v40, %s1084_s0 }
  0x4b   :  { %339 = vrot.lane.b32.xlu1 %v1341_v29, %s1084_s0  ;;  %337 = vrot.lane.b32.xlu0 %v1345_v41, %s1084_s0 }
  0x4f   :  { %383 = vrot.lane.b32.xlu1 %v1328_v38, %s1085_s1  ;;  %381 = vrot.lane.b32.xlu0 %v1333_v40, %s1085_s1 }
  0x53   :  { %387 = vrot.lane.b32.xlu1 %v1341_v29, %s1085_s1  ;;  %385 = vrot.lane.b32.xlu0 %v1345_v41, %s1085_s1 }
  0x57   :  { %432 = vrot.lane.b32.xlu1 %v1174_v35, %s1086_s24  ;;  %430 = vrot.lane.b32.xlu0 %v1195_v48, %s1086_s24 }
  0x5b   :  { %436 = vrot.lane.b32.xlu1 %v1169_v31, %s1086_s24  ;;  %434 = vrot.lane.b32.xlu0 %v1245_v18, %s1086_s24 }
  0x5f   :  { %440 = vrot.lane.b32.xlu1 %v1193_v47, %s1086_s24  ;;  %438 = vrot.lane.b32.xlu0 %v1215_v59, %s1086_s24 }
  0x63   :  { %444 = vrot.lane.b32.xlu1 %v1213_v58, %s1086_s24  ;;  %442 = vrot.lane.b32.xlu0 %v1226_v6, %s1086_s24 }
  0x67   :  { %480 = vrot.lane.b32.xlu1 %v1174_v35, %s1087_s25  ;;  %478 = vrot.lane.b32.xlu0 %v1195_v48, %s1087_s25 }
  0x6b   :  { %484 = vrot.lane.b32.xlu1 %v1169_v31, %s1087_s25  ;;  %482 = vrot.lane.b32.xlu0 %v1245_v18, %s1087_s25 }
  0x6f   :  { %488 = vrot.lane.b32.xlu1 %v1193_v47, %s1087_s25  ;;  %486 = vrot.lane.b32.xlu0 %v1215_v59, %s1087_s25 }
  0x73   :  { %492 = vrot.lane.b32.xlu1 %v1213_v58, %s1087_s25  ;;  %490 = vrot.lane.b32.xlu0 %v1226_v6, %s1087_s25 }
  0x77   :  { %343 = vrot.lane.b32.xlu1 %v1282_v45, %s1084_s0  ;;  %341 = vrot.lane.b32.xlu0 %v1289_v53, %s1084_s0 }
  0x7b   :  { %347 = vrot.lane.b32.xlu1 %v1308_v23, %s1084_s0  ;;  %345 = vrot.lane.b32.xlu0 %v1310_v26, %s1084_s0 }
  0x7f   :  { %391 = vrot.lane.b32.xlu1 %v1282_v45, %s1085_s1  ;;  %389 = vrot.lane.b32.xlu0 %v1289_v53, %s1085_s1 }
  0x83   :  { %395 = vrot.lane.b32.xlu1 %v1308_v23, %s1085_s1  ;;  %393 = vrot.lane.b32.xlu0 %v1310_v26, %s1085_s1 }
  0x87   :  { %448 = vrot.lane.b32.xlu1 %v1328_v38, %s1086_s24  ;;  %446 = vrot.lane.b32.xlu0 %v1333_v40, %s1086_s24 }
  0x8b   :  { %452 = vrot.lane.b32.xlu1 %v1341_v29, %s1086_s24  ;;  %450 = vrot.lane.b32.xlu0 %v1345_v41, %s1086_s24 }
  0x8f   :  { %496 = vrot.lane.b32.xlu1 %v1328_v38, %s1087_s25  ;;  %494 = vrot.lane.b32.xlu0 %v1333_v40, %s1087_s25 }
  0x93   :  { %500 = vrot.lane.b32.xlu1 %v1341_v29, %s1087_s25  ;;  %498 = vrot.lane.b32.xlu0 %v1345_v41, %s1087_s25 }
  0x97   :  { %456 = vrot.lane.b32.xlu1 %v1282_v45, %s1086_s24  ;;  %454 = vrot.lane.b32.xlu0 %v1289_v53, %s1086_s24 }
  0x99   :  { %v324_v2 = vpop.permute.xlu1 %323  ;;  %v320_v42 = vpop.permute.xlu0 %319 }
  0x9b   :  { %460 = vrot.lane.b32.xlu1 %v1308_v23, %s1086_s24  ;;  %458 = vrot.lane.b32.xlu0 %v1310_v26, %s1086_s24 }
  0x9d   :  { %v328_v43 = vpop.permute.xlu1 %327  ;;  %v318_v44 = vpop.permute.xlu0 %317 }
  0x9f   :  { %504 = vrot.lane.b32.xlu1 %v1282_v45, %s1087_s25  ;;  %502 = vrot.lane.b32.xlu0 %v1289_v53, %s1087_s25 }
  0xa1   :  { %v332_v46 = vpop.permute.xlu1 %331  ;;  %v326_v49 = vpop.permute.xlu0 %325 }
  0xa3   :  { %508 = vrot.lane.b32.xlu1 %v1308_v23, %s1087_s25  ;;  %506 = vrot.lane.b32.xlu0 %v1310_v26, %s1087_s25 }
  0xa5   :  { %v368_v50 = vpop.permute.xlu1 %367  ;;  %v330_v51 = vpop.permute.xlu0 %329 }
  0xa9   :  { %v322_v52 = vpop.permute.xlu1 %321  ;;  %v366_v55 = vpop.permute.xlu0 %365 }
  0xad   :  { %v372_v56 = vpop.permute.xlu1 %371  ;;  %v370_v60 = vpop.permute.xlu0 %369 }
  0xae   :  { %v417_v57 = vsel %vm1823_vm4, %v324_v2, %v372_v56 }
  0xaf   :  { %v1446_v61 = vsel %vm1822_vm5, -inf, %v417_v57 }
  0xb1   :  { %v376_v62 = vpop.permute.xlu1 %375  ;;  %v374_v7 = vpop.permute.xlu0 %373 }
  0xb2   :  { %v419_v63 = vsel %vm1823_vm4, %v328_v43, %v376_v62  ;;  %v418_v8 = vsel %vm1823_vm4, %v326_v49, %v374_v7 }
  0xb3   :  { %v1451_v0 = vsel %vm1822_vm5, -inf, %v419_v63  ;;  %v1456_v27 = vsel %vm1822_vm5, -inf, %v418_v8 }
  0xb5   :  { %v380_v20 = vpop.permute.xlu1 %379  ;;  %v378_v28 = vpop.permute.xlu0 %377 }
  0xb6   :  { %v421_v21 = vsel %vm1823_vm4, %v332_v46, %v380_v20  ;;  %v420_v33 = vsel %vm1823_vm4, %v330_v51, %v378_v28 }
  0xb7   :  { %v1461_v32 = vsel %vm1822_vm5, -inf, %v421_v21  ;;  %v1466_v34 = vsel %vm1822_vm5, -inf, %v420_v33 }
  0xb9   :  { %v336_v37 = vpop.permute.xlu1 %335  ;;  %v334_v39 = vpop.permute.xlu0 %333 }
  0xbd   :  { %v340_v22 = vpop.permute.xlu1 %339  ;;  %v338_v24 = vpop.permute.xlu0 %337 }
  0xc1   :  { %v384_v1 = vpop.permute.xlu1 %383  ;;  %v382_v43 = vpop.permute.xlu0 %381 }
  0xc2   :  { %v423_v2 = vsel %vm1823_vm4, %v336_v37, %v384_v1  ;;  %v422_v49 = vsel %vm1823_vm4, %v334_v39, %v382_v43  ;;  %v414_v1 = vsel %vm1823_vm4, %v318_v44, %v366_v55 }
  0xc3   :  { %v1471_v46 = vsel %vm1822_vm5, -inf, %v423_v2  ;;  %v1476_v51 = vsel %vm1822_vm5, -inf, %v422_v49  ;;  %v546_v49 = vsel %vm1822_vm5, -inf, %v414_v1  ;;  %v64_v1 = vld [vmem:[#allocation2 + $0x18] sm:$0xff] }
  0xc4   :  { %vm664_vm2 = vcmp.ge.f32.partialorder %v64_v1, 0.6 }
  0xc5   :  { %v388_v56 = vpop.permute.xlu1 %387  ;;  %v386_v62 = vpop.permute.xlu0 %385 }
  0xc6   :  { %v425_v57 = vsel %vm1823_vm4, %v340_v22, %v388_v56  ;;  %v424_v7 = vsel %vm1823_vm4, %v338_v24, %v386_v62  ;;  %v415_v22 = vsel %vm1823_vm4, %v320_v42, %v368_v50  ;;  %v416_v56 = vsel %vm1823_vm4, %v322_v52, %v370_v60  ;;  %v61_v50 = vld [vmem:[#allocation2] sm:$0xff] }
  0xc7   :  { %v1481_v63 = vsel %vm1822_vm5, -inf, %v425_v57  ;;  %v1486_v8 = vsel %vm1822_vm5, -inf, %v424_v7  ;;  %v547_v24 = vsel %vm1822_vm5, -inf, %v415_v22  ;;  %v62_v57 = vld [vmem:[#allocation2 + $0x8] sm:$0xff]  ;;  %v581_v7 = vmax.f32 %v546_v49, %v1195_v48  ;;  %v63_v49 = vld [vmem:[#allocation2 + $0x10] sm:$0xff] }
  0xc8   :  { %v582_v42 = vmax.f32 %v547_v24, %v1174_v35  ;;  %v548_v52 = vsel %vm1822_vm5, -inf, %v416_v56  ;;  %vm662_vm9 = vcmp.ge.f32.partialorder %v62_v57, 0.6  ;;  %vm661_vm12 = vcmp.ge.f32.partialorder %v61_v50, 0.6 }
  0xc9   :  { %v433_v20 = vpop.permute.xlu1 %432  ;;  %v431_v21 = vpop.permute.xlu0 %430  ;;  %v584_v24 = vmax.f32 %v1446_v61, %v1169_v31  ;;  %v65_v61 = vld [vmem:[#allocation2 + $0x20] sm:$0xff] }
  0xcd   :  { %v437_v28 = vpop.permute.xlu1 %436  ;;  %v435_v33 = vpop.permute.xlu0 %434 }
  0xd1   :  { %v441_v37 = vpop.permute.xlu1 %440  ;;  %v1488_v39 = vpop.permute.xlu0 %438 }
  0xd5   :  { %v1492_v2 = vpop.permute.xlu1 %444  ;;  %v1494_v43 = vpop.permute.xlu0 %442 }
  0xd9   :  { %v481_v62 = vpop.permute.xlu1 %480  ;;  %v479_v55 = vpop.permute.xlu0 %478 }
  0xda   :  { %v528_v44 = vsel %vm526_vm6, %v433_v20, %v481_v62  ;;  %v527_v9 = vsel %vm526_vm6, %v431_v21, %v479_v55  ;;  %v585_v55 = vmax.f32 %v1456_v27, %v1215_v59 }
  0xdb   :  { %v566_v22 = vsel %vm562_vm7, -inf, %v528_v44  ;;  %v565_v35 = vsel %vm562_vm7, -inf, %v527_v9  ;;  %v583_v9 = vmax.f32 %v548_v52, %v1245_v18  ;;  %v1088_v18 = vmov 0  }
  0xdc   :  { %v598_v60 = vmax.f32 %v582_v42, %v566_v22  ;;  %v597_v20 = vmax.f32 %v581_v7, %v565_v35  ;;  %v586_v44 = vmax.f32 %v1451_v0, %v1193_v47  ;;  %v66_v7 = vld [vmem:[#allocation2 + $0x28] sm:$0xff] }
  0xdd   :  { %v485_v48 = vpop.permute.xlu1 %484  ;;  %v483_v56 = vpop.permute.xlu0 %482 }
  0xde   :  { %vm614_vm13 = vcmp.eq.f32.partialorder %v1137_v10, %v598_v60  ;;  %v530_v21 = vsel %vm526_vm6, %v437_v28, %v485_v48  ;;  %vm613_vm0 = vcmp.eq.f32.partialorder %v1130_v5, %v597_v20  ;;  %v529_v31 = vsel %vm526_vm6, %v435_v33, %v483_v56 }
  0xdf   :  { %vm646_vm15 = vmand %vm614_vm13, %vm630_vm8  ;;  %v568_v62 = vsel %vm562_vm7, -inf, %v530_v21  ;;  %v567_v10 = vsel %vm562_vm7, -inf, %v529_v31  ;;  %vm765_vm8 = vcmask 123904   ;;  %v588_v60 = vmax.f32 %v1461_v32, %v1213_v58 }
  0xe0   :  { %vm1527_vm1 = vmand %vm646_vm15, %vm662_vm9  ;;  %v600_v28 = vmax.f32 %v584_v24, %v568_v62  ;;  %vm663_vm9 = vcmp.ge.f32.partialorder %v63_v49, 0.6  ;;  %v599_v33 = vmax.f32 %v583_v9, %v567_v10  ;;  %vm634_vm15 = vcmp.ge.f32.partialorder %v1145_v16, 0.6 }
  0xe1   :  { %v877_v42 = vsel %vm1527_vm1, 1, %v1088_v18  ;;  %vm645_vm13 = vmand %vm613_vm0, %vm629_vm11  ;;  %v489_v57 = vpop.permute.xlu1 %488  ;;  %vm633_vm11 = vcmp.ge.f32.partialorder %v1139_v11, 0.6  ;;  %v487_v5 = vpop.permute.xlu0 %486 }
  0xe2   :  { %vm677_vm5 = vmand %vm645_vm13, %vm661_vm12  ;;  %vm616_vm4 = vcmp.eq.f32.partialorder %v1127_v4, %v600_v28  ;;  %v532_v22 = vsel %vm526_vm6, %v441_v37, %v489_v57  ;;  %v894_v52 = vsel %vm892_vm10, %v877_v42, 0  ;;  %v531_v0 = vsel %vm526_vm6, %v1488_v39, %v487_v5 }
  0xe3   :  { %vm693_vm0 = vmpackc.low %vm1527_vm1, %vm677_vm5  ;;  %v876_v47 = vsel %vm677_vm5, 1, %v1088_v18  ;;  %v570_v59 = vsel %vm562_vm7, -inf, %v532_v22  ;;  %vm615_vm13 = vcmp.eq.f32.partialorder %v1125_v3, %v599_v33  ;;  %v569_v50 = vsel %vm562_vm7, -inf, %v531_v0 }
  0xe4   :  { %vm694_vm12 = vmpackc.even %vm693_vm0, %vm693_vm0  ;;  %v893_v27 = vsel %vm892_vm10, %v876_v47, 0  ;;  %v602_v37 = vmax.f32 %v586_v44, %v570_v59  ;;  %vm666_vm1 = vcmp.ge.f32.partialorder %v66_v7, 0.6  ;;  %v601_v39 = vmax.f32 %v585_v55, %v569_v50  ;;  %v68_v59 = vld [vmem:[#allocation2 + $0x38] sm:$0xff]  ;;  %v67_v50 = vld [vmem:[#allocation2 + $0x30] sm:$0xff] }
  0xe5   :  { %v709_v35 = vsel %vm694_vm12, 16843009, %v1088_v18  ;;  %vm648_vm5 = vmand %vm616_vm4, %vm632_vm14  ;;  %v493_v20 = vpop.permute.xlu1 %492  ;;  %v900_v21 = vadd.s32 %v894_v52, %v893_v27  ;;  %v491_v32 = vpop.permute.xlu0 %490  ;;  %v587_v3 = vmax.f32 %v1466_v34, %v1226_v6 }
  0xe6   :  { %v717_v48 = vunpack.c.0.s8 %v709_v35  ;;  %v718_v24 = vunpack.c.1.s8 %v709_v35  ;;  %vm1568_vm0 = vmand %vm648_vm5, %vm664_vm2  ;;  %v534_v58 = vsel %vm526_vm6, %v1492_v2, %v493_v20  ;;  %vm618_vm14 = vcmp.eq.f32.partialorder %v1145_v16, %v602_v37 }
  0xe7   :  { %v879_v4 = vsel %vm1568_vm0, 1, %v1088_v18  ;;  %vm647_vm4 = vmand %vm615_vm13, %vm631_vm3  ;;  %v572_v1 = vsel %vm562_vm7, -inf, %v534_v58  ;;  %v533_v9 = vsel %vm526_vm6, %v1494_v43, %v491_v32  ;;  %vm665_vm5 = vcmp.ge.f32.partialorder %v65_v61, 0.6 }
  0xe8   :  { %v733_v62 = vpack.c.b16 %v717_v48, %v717_v48  ;;  %v735_v2 = vpack.c.b16 %v718_v24, %v718_v24  ;;  %v896_v31 = vsel %vm892_vm10, %v879_v4, 0  ;;  %vm679_vm2 = vmand %vm647_vm4, %vm663_vm9  ;;  %v604_v28 = vmax.f32 %v588_v60, %v572_v1 }
  0xe9   :  { %v898_v10 = vadd.s32 %v900_v21, %v896_v31  ;;  %vm695_vm3 = vmpackc.low %vm1568_vm0, %vm679_vm2  ;;  %v878_v42 = vsel %vm679_vm2, 1, %v1088_v18  ;;  %v571_v43 = vsel %vm562_vm7, -inf, %v533_v9  ;;  %v1595_v33 = vpop.permute.xlu1 %343  ;;  %vm617_vm9 = vcmp.eq.f32.partialorder %v1139_v11, %v601_v39  ;;  %v1599_v55 = vpop.permute.xlu0 %341 }
  0xea   :  { %v734_v57 = vpack.c.b8 %v733_v62, %v733_v62  ;;  %v736_v44 = vpack.c.b8 %v735_v2, %v735_v2  ;;  %vm696_vm12 = vmpackc.even %vm695_vm3, %vm695_vm3  ;;  %v895_v49 = vsel %vm892_vm10, %v878_v42, 0  ;;  %v603_v22 = vmax.f32 %v587_v3, %v571_v43 }
  0xeb   :  { %v710_v6 = vsel %vm696_vm12, 16843009, %v1088_v18  ;;  %v904_v34 = vadd.s32 %v898_v10, %v895_v49  ;;  %vm650_vm13 = vmand %vm618_vm14, %vm634_vm15  ;;  %vm636_vm4 = vcmp.ge.f32.partialorder %v1160_v25, 0.6  ;;  %vm620_vm14 = vcmp.eq.f32.partialorder %v1160_v25, %v604_v28 }
  0xec   :  { %766 = vst.msk [vmem:[#allocation7] sm:$0x3] %vm765_vm8, %v734_v57  ;;  %767 = vst.msk [vmem:[#allocation7 + $0x2] sm:$0x3] %vm765_vm8, %v736_v44  ;;  %v719_v5 = vunpack.c.0.s8 %v710_v6  ;;  %v720_v52 = vunpack.c.1.s8 %v710_v6  ;;  %vm635_vm3 = vcmp.ge.f32.partialorder %v1167_v30, 0.6 }
  0xed   :  { %vm1609_vm0 = vmand %vm650_vm13, %vm666_vm1  ;;  %v1619_v16 = vpop.permute.xlu1 %347  ;;  %v1624_v60 = vpop.permute.xlu0 %345 }
  0xee   :  { %v881_v0 = vsel %vm1609_vm0, 1, %v1088_v18  ;;  %vm649_vm15 = vmand %vm617_vm9, %vm633_vm11  ;;  %v737_v27 = vpack.c.b16 %v719_v5, %v719_v5  ;;  %v739_v37 = vpack.c.b16 %v720_v52, %v720_v52  ;;  %vm668_vm11 = vcmp.ge.f32.partialorder %v68_v59, 0.6 }
  0xef   :  { %v899_v7 = vsel %vm892_vm10, %v881_v0, 0  ;;  %vm681_vm1 = vmand %vm649_vm15, %vm665_vm5  ;;  %vm619_vm9 = vcmp.eq.f32.partialorder %v1167_v30, %v603_v22  ;;  %vm667_vm5 = vcmp.ge.f32.partialorder %v67_v50, 0.6 }
  0xf0   :  { %v902_v35 = vadd.s32 %v904_v34, %v899_v7  ;;  %vm697_vm2 = vmpackc.low %vm1609_vm0, %vm681_vm1  ;;  %v880_v11 = vsel %vm681_vm1, 1, %v1088_v18  ;;  %v738_v39 = vpack.c.b8 %v737_v27, %v737_v27  ;;  %v740_v20 = vpack.c.b8 %v739_v37, %v739_v37  ;;  %v70_v7 = vld [vmem:[#allocation2 + $0x48] sm:$0xff] }
  0xf1   :  { %vm698_vm12 = vmpackc.even %vm697_vm2, %vm697_vm2  ;;  %v897_v48 = vsel %vm892_vm10, %v880_v11, 0  ;;  %v1637_v56 = vpop.permute.xlu1 %391  ;;  %v1646_v1 = vpop.permute.xlu0 %389  ;;  %v590_v37 = vmax.f32 %v1471_v46, %v1328_v38  ;;  %v589_v11 = vmax.f32 %v1476_v51, %v1333_v40  ;;  %vm638_vm2 = vcmp.ge.f32.partialorder %v1237_v14, 0.6 }
  0xf2   :  { %v711_v24 = vsel %vm698_vm12, 16843009, %v1088_v18  ;;  %v906_v21 = vadd.s32 %v902_v35, %v897_v48  ;;  %vm652_vm13 = vmand %vm620_vm14, %vm636_vm4  ;;  %768 = vst.msk [vmem:[#allocation7 + $0x4] sm:$0x3] %vm765_vm8, %v738_v39  ;;  %v592_v40 = vmax.f32 %v1481_v63, %v1341_v29 }
  0xf3   :  { %769 = vst.msk [vmem:[#allocation7 + $0x6] sm:$0x3] %vm765_vm8, %v740_v20  ;;  %v721_v58 = vunpack.c.0.s8 %v711_v24  ;;  %v722_v32 = vunpack.c.1.s8 %v711_v24  ;;  %vm1642_vm0 = vmand %vm652_vm13, %vm668_vm11  ;;  %v69_v20 = vld [vmem:[#allocation2 + $0x40] sm:$0xff]  ;;  %vm670_vm11 = vcmp.ge.f32.partialorder %v70_v7, 0.6  ;;  %v74_v7 = vld [vmem:[#allocation2 + $0x68] sm:$0xff] }
  0xf4   :  { %v883_v25 = vsel %vm1642_vm0, 1, %v1088_v18  ;;  %vm651_vm15 = vmand %vm619_vm9, %vm635_vm3  ;;  %vm637_vm3 = vcmp.ge.f32.partialorder %v1235_v13, 0.6  ;;  %vm669_vm9 = vcmp.ge.f32.partialorder %v69_v20, 0.6 }
  0xf5   :  { %v741_v9 = vpack.c.b16 %v721_v58, %v721_v58  ;;  %v743_v62 = vpack.c.b16 %v722_v32, %v722_v32  ;;  %v903_v2 = vsel %vm892_vm10, %v883_v25, 0  ;;  %vm683_vm4 = vmand %vm651_vm15, %vm667_vm5  ;;  %v1657_v28 = vpop.permute.xlu1 %395  ;;  %v1660_v30 = vpop.permute.xlu0 %393  ;;  %v591_v32 = vmax.f32 %v1486_v8, %v1345_v41 }
  0xf6   :  { %v908_v31 = vadd.s32 %v906_v21, %v903_v2  ;;  %vm699_vm1 = vmpackc.low %vm1642_vm0, %vm683_vm4  ;;  %v882_v61 = vsel %vm683_vm4, 1, %v1088_v18  ;;  %vm1835_vm15 = vcmask 7168  }
  0xf7   :  { %v742_v3 = vpack.c.b8 %v741_v9, %v741_v9  ;;  %v744_v10 = vpack.c.b8 %v743_v62, %v743_v62  ;;  %vm700_vm14 = vmpackc.even %vm699_vm1, %vm699_vm1  ;;  %v901_v42 = vsel %vm892_vm10, %v882_v61, 0  ;;  %v427_v41 = vsel %vm1835_vm15, %v1595_v33, %v1637_v56  ;;  %v71_v33 = vld [vmem:[#allocation2 + $0x50] sm:$0xff] }
  0xf8   :  { %v712_v43 = vsel %vm700_vm14, 16843009, %v1088_v18  ;;  %v910_v57 = vadd.s32 %v908_v31, %v901_v42  ;;  %vm1836_vm1 = vmmov %vm1835_vm15 }
  0xf9   :  { %770 = vst.msk [vmem:[#allocation7 + $0x8] sm:$0x3] %vm765_vm8, %v742_v3  ;;  %771 = vst.msk [vmem:[#allocation7 + $0xa] sm:$0x3] %vm765_vm8, %v744_v10  ;;  %v723_v44 = vunpack.c.0.s8 %v712_v43  ;;  %v724_v49 = vunpack.c.1.s8 %v712_v43  ;;  %v449_v6 = vpop.permute.xlu1 %448  ;;  %v447_v5 = vpop.permute.xlu0 %446  ;;  %v426_v31 = vsel %vm1836_vm1, %v1599_v55, %v1646_v1  ;;  %vm671_vm1 = vcmp.ge.f32.partialorder %v71_v33, 0.6 }
  0xfa   :  { %v1846_v33 = vld [vmem:[#allocation14_spill] sm:$0xff] }
  0xfb   :  { %v745_v34 = vpack.c.b16 %v723_v44, %v723_v44  ;;  %v747_v22 = vpack.c.b16 %v724_v49, %v724_v49 }
  0xfd   :  { %v746_v52 = vpack.c.b8 %v745_v34, %v745_v34  ;;  %v748_v47 = vpack.c.b8 %v747_v22, %v747_v22  ;;  %v453_v59 = vpop.permute.xlu1 %452  ;;  %v451_v0 = vpop.permute.xlu0 %450 }
  0xff   :  { %772 = vst.msk [vmem:[#allocation7 + $0xc] sm:$0x3] %vm765_vm8, %v746_v52  ;;  %773 = vst.msk [vmem:[#allocation7 + $0xe] sm:$0x3] %vm765_vm8, %v748_v47 }
 0x101   :  { %v497_v27 = vpop.permute.xlu1 %496  ;;  %v495_v35 = vpop.permute.xlu0 %494 }
 0x102   :  { %v536_v50 = vsel %vm526_vm6, %v449_v6, %v497_v27  ;;  %v535_v48 = vsel %vm526_vm6, %v447_v5, %v495_v35  ;;  %v73_v35 = vld [vmem:[#allocation2 + $0x60] sm:$0xff] }
 0x103   :  { %v574_v39 = vsel %vm562_vm7, -inf, %v536_v50  ;;  %v573_v21 = vsel %vm562_vm7, -inf, %v535_v48 }
 0x104   :  { %v606_v24 = vmax.f32 %v590_v37, %v574_v39  ;;  %v605_v38 = vmax.f32 %v589_v11, %v573_v21 }
 0x105   :  { %v501_v46 = vpop.permute.xlu1 %500  ;;  %v499_v58 = vpop.permute.xlu0 %498 }
 0x106   :  { %vm622_vm12 = vcmp.eq.f32.partialorder %v1237_v14, %v606_v24  ;;  %v538_v51 = vsel %vm526_vm6, %v453_v59, %v501_v46  ;;  %vm621_vm5 = vcmp.eq.f32.partialorder %v1235_v13, %v605_v38  ;;  %v537_v25 = vsel %vm526_vm6, %v451_v0, %v499_v58  ;;  %v72_v14 = vld [vmem:[#allocation2 + $0x58] sm:$0xff] }
 0x107   :  { %vm654_vm13 = vmand %vm622_vm12, %vm638_vm2  ;;  %v576_v4 = vsel %vm562_vm7, -inf, %v538_v51  ;;  %v575_v63 = vsel %vm562_vm7, -inf, %v537_v25  ;;  %vm640_vm2 = vcmp.ge.f32.partialorder %v1247_v19, 0.6  ;;  %vm672_vm12 = vcmp.ge.f32.partialorder %v72_v14, 0.6 }
 0x108   :  { %vm1689_vm0 = vmand %vm654_vm13, %vm670_vm11  ;;  %v608_v29 = vmax.f32 %v592_v40, %v576_v4  ;;  %v607_v62 = vmax.f32 %v591_v32, %v575_v63  ;;  %vm1837_vm13 = vcmp.eq.s32.totalorder %v1440_v54, 0 }
 0x109   :  { %v885_v8 = vsel %vm1689_vm0, 1, %v1088_v18  ;;  %vm653_vm4 = vmand %vm621_vm5, %vm637_vm3  ;;  %v457_v2 = vpop.permute.xlu1 %456  ;;  %v455_v56 = vpop.permute.xlu0 %454  ;;  %v559_v55 = vsel %vm1837_vm13, -inf, %v427_v41 }
 0x10a   :  { %v907_v61 = vsel %vm892_vm10, %v885_v8, 0  ;;  %vm685_vm14 = vmand %vm653_vm4, %vm669_vm9  ;;  %vm624_vm11 = vcmp.eq.f32.partialorder %v1247_v19, %v608_v29  ;;  %vm639_vm9 = vcmp.ge.f32.partialorder %v1268_v36, 0.6  ;;  %vm623_vm15 = vcmp.eq.f32.partialorder %v1268_v36, %v607_v62 }
 0x10b   :  { %v912_v3 = vadd.s32 %v910_v57, %v907_v61  ;;  %vm701_vm3 = vmpackc.low %vm1689_vm0, %vm685_vm14  ;;  %v884_v13 = vsel %vm685_vm14, 1, %v1088_v18  ;;  %vm1839_vm14 = vcmask 7168   ;;  %v594_v19 = vmax.f32 %v559_v55, %v1282_v45  ;;  %v75_v61 = vld [vmem:[#allocation2 + $0x70] sm:$0xff] }
 0x10c   :  { %vm702_vm5 = vmpackc.even %vm701_vm3, %vm701_vm3  ;;  %v905_v1 = vsel %vm892_vm10, %v884_v13, 0  ;;  %v429_v44 = vsel %vm1839_vm14, %v1619_v16, %v1657_v28 }
 0x10d   :  { %vm1838_vm4 = vmmov %vm1837_vm13  ;;  %v713_v42 = vsel %vm702_vm5, 16843009, %v1088_v18  ;;  %v914_v43 = vadd.s32 %v912_v3, %v905_v1  ;;  %v461_v57 = vpop.permute.xlu1 %460  ;;  %v459_v5 = vpop.permute.xlu0 %458  ;;  %vm641_vm5 = vcmp.ge.f32.partialorder %v1239_v15, 0.6 }
 0x10e   :  { %v558_v10 = vsel %vm1838_vm4, -inf, %v426_v31  ;;  %vm656_vm0 = vmand %vm624_vm11, %vm640_vm2  ;;  %v725_v6 = vunpack.c.0.s8 %v713_v42  ;;  %v726_v34 = vunpack.c.1.s8 %v713_v42  ;;  %vm642_vm11 = vcmp.ge.f32.partialorder %v1233_v12, 0.6 }
 0x10f   :  { %vm1840_vm3 = vmmov %vm1839_vm14  ;;  %v593_v16 = vmax.f32 %v558_v10, %v1289_v53  ;;  %v561_v45 = vsel %vm1838_vm4, -inf, %v429_v44  ;;  %vm673_vm14 = vcmp.ge.f32.partialorder %v73_v35, 0.6 }
 0x110   :  { %v428_v49 = vsel %vm1840_vm3, %v1624_v60, %v1660_v30  ;;  %vm1732_vm13 = vmand %vm656_vm0, %vm672_vm12  ;;  %v749_v60 = vpack.c.b16 %v725_v6, %v725_v6  ;;  %v751_v28 = vpack.c.b16 %v726_v34, %v726_v34  ;;  %v596_v51 = vmax.f32 %v561_v45, %v1308_v23 }
 0x111   :  { %v887_v52 = vsel %vm1732_vm13, 1, %v1088_v18  ;;  %vm655_vm2 = vmand %vm623_vm15, %vm639_vm9  ;;  %v505_v0 = vpop.permute.xlu1 %504  ;;  %v503_v11 = vpop.permute.xlu0 %502 }
 0x112   :  { %v911_v30 = vsel %vm892_vm10, %v887_v52, 0  ;;  %vm687_vm12 = vmand %vm655_vm2, %vm671_vm1  ;;  %v750_v53 = vpack.c.b8 %v749_v60, %v749_v60  ;;  %v752_v27 = vpack.c.b8 %v751_v28, %v751_v28  ;;  %v540_v50 = vsel %vm526_vm6, %v457_v2, %v505_v0  ;;  %v76_v2 = vld [vmem:[#allocation2 + $0x78] sm:$0xff] }
 0x113   :  { %vm1843_vm0 = vmmov %vm1838_vm4  ;;  %v916_v36 = vadd.s32 %v914_v43, %v911_v30  ;;  %v886_v59 = vsel %vm687_vm12, 1, %v1088_v18  ;;  %v578_v48 = vsel %vm562_vm7, -inf, %v540_v50  ;;  %v539_v24 = vsel %vm526_vm6, %v455_v56, %v503_v11 }
 0x114   :  { %v560_v47 = vsel %vm1843_vm0, -inf, %v428_v49  ;;  %vm703_vm9 = vmpackc.low %vm1732_vm13, %vm687_vm12  ;;  %v909_v37 = vsel %vm892_vm10, %v886_v59, 0  ;;  %774 = vst.msk [vmem:[#allocation7 + $0x10] sm:$0x3] %vm765_vm8, %v750_v53  ;;  %v610_v46 = vmax.f32 %v594_v19, %v578_v48  ;;  %v577_v40 = vsel %vm562_vm7, -inf, %v539_v24 }
 0x115   :  { %vm704_vm15 = vmpackc.even %vm703_vm9, %vm703_vm9  ;;  %v918_v20 = vadd.s32 %v916_v36, %v909_v37  ;;  %775 = vst.msk [vmem:[#allocation7 + $0x12] sm:$0x3] %vm765_vm8, %v752_v27  ;;  %vm674_vm1 = vcmp.ge.f32.partialorder %v74_v7, 0.6  ;;  %v609_v58 = vmax.f32 %v593_v16, %v577_v40  ;;  %v509_v32 = vpop.permute.xlu1 %508  ;;  %v507_v14 = vpop.permute.xlu0 %506  ;;  %v595_v29 = vmax.f32 %v560_v47, %v1310_v26 }
 0x116   :  { %v714_v39 = vsel %vm704_vm15, 16843009, %v1088_v18  ;;  %vm626_vm3 = vcmp.eq.f32.partialorder %v1233_v12, %v610_v46  ;;  %v542_v9 = vsel %vm526_vm6, %v461_v57, %v509_v32  ;;  %v541_v63 = vsel %vm526_vm6, %v459_v5, %v507_v14 }
 0x117   :  { %v727_v21 = vunpack.c.0.s8 %v714_v39  ;;  %v728_v38 = vunpack.c.1.s8 %v714_v39  ;;  %vm658_vm13 = vmand %vm626_vm3, %vm642_vm11  ;;  %vm625_vm2 = vcmp.eq.f32.partialorder %v1239_v15, %v609_v58  ;;  %v580_v23 = vsel %vm562_vm7, -inf, %v542_v9 }
 0x118   :  { %vm1777_vm12 = vmand %vm658_vm13, %vm674_vm1  ;;  %v612_v31 = vmax.f32 %v596_v51, %v580_v23  ;;  %v579_v12 = vsel %vm562_vm7, -inf, %v541_v63  ;;  %vm644_vm4 = vcmp.ge.f32.partialorder %v1241_v17, 0.6  ;;  %vm643_vm15 = vcmp.ge.f32.partialorder %v1846_v33, 0.6 }
 0x119   :  { %v753_v4 = vpack.c.b16 %v727_v21, %v727_v21  ;;  %v755_v25 = vpack.c.b16 %v728_v38, %v728_v38  ;;  %vm657_vm11 = vmand %vm625_vm2, %vm641_vm5  ;;  %v611_v26 = vmax.f32 %v595_v29, %v579_v12  ;;  %v889_v54 = vsel %vm1777_vm12, 1, %v1088_v18 }
 0x11a   :  { %vm689_vm6 = vmand %vm657_vm11, %vm673_vm14  ;;  %vm628_vm0 = vcmp.eq.f32.partialorder %v1241_v17, %v612_v31  ;;  %vm676_vm5 = vcmp.ge.f32.partialorder %v76_v2, 0.6  ;;  %vm675_vm3 = vcmp.ge.f32.partialorder %v75_v61, 0.6  ;;  %v915_v1 = vsel %vm892_vm10, %v889_v54, 0 }
 0x11b   :  { %v754_v41 = vpack.c.b8 %v753_v4, %v753_v4  ;;  %v756_v8 = vpack.c.b8 %v755_v25, %v755_v25  ;;  %vm705_vm7 = vmpackc.low %vm1777_vm12, %vm689_vm6  ;;  %v888_v15 = vsel %vm689_vm6, 1, %v1088_v18  ;;  %vm627_vm1 = vcmp.eq.f32.partialorder %v1846_v33, %v611_v26 }
 0x11c   :  { %vm706_vm9 = vmpackc.even %vm705_vm7, %vm705_vm7  ;;  %v913_v56 = vsel %vm892_vm10, %v888_v15, 0 }
 0x11d   :  { %776 = vst.msk [vmem:[#allocation7 + $0x14] sm:$0x3] %vm765_vm8, %v754_v41  ;;  %777 = vst.msk [vmem:[#allocation7 + $0x16] sm:$0x3] %vm765_vm8, %v756_v8  ;;  %v715_v17 = vsel %vm706_vm9, 16843009, %v1088_v18  ;;  %v920_v3 = vadd.s32 %v918_v20, %v913_v56 }
 0x11e   :  { %vm660_vm14 = vmand %vm628_vm0, %vm644_vm4  ;;  %v729_v13 = vunpack.c.0.s8 %v715_v17  ;;  %v730_v55 = vunpack.c.1.s8 %v715_v17 }
 0x11f   :  { %vm692_vm13 = vmand %vm660_vm14, %vm676_vm5  ;;  %v921_v10 = vadd.s32 %v920_v3, %v915_v1 }
 0x120   :  { %vm659_vm2 = vmand %vm627_vm1, %vm643_vm15  ;;  %v757_v42 = vpack.c.b16 %v729_v13, %v729_v13  ;;  %v759_v43 = vpack.c.b16 %v730_v55, %v730_v55  ;;  %v891_v57 = vsel %vm692_vm13, 1, %v1088_v18 }
 0x121   :  { %vm691_vm12 = vmand %vm659_vm2, %vm675_vm3  ;;  %v919_v16 = vsel %vm892_vm10, %v891_v57, 0 }
 0x122   :  { %vm707_vm11 = vmpackc.low %vm692_vm13, %vm691_vm12  ;;  %v890_v44 = vsel %vm691_vm12, 1, %v1088_v18  ;;  %v758_v49 = vpack.c.b8 %v757_v42, %v757_v42  ;;  %v760_v6 = vpack.c.b8 %v759_v43, %v759_v43 }
 0x123   :  { %vm708_vm6 = vmpackc.even %vm707_vm11, %vm707_vm11  ;;  %v917_v34 = vsel %vm892_vm10, %v890_v44, 0 }
 0x124   :  { %v716_v22 = vsel %vm708_vm6, 16843009, %v1088_v18  ;;  %v922_v5 = vadd.s32 %v921_v10, %v917_v34  ;;  %778 = vst.msk [vmem:[#allocation7 + $0x18] sm:$0x3] %vm765_vm8, %v758_v49  ;;  %779 = vst.msk [vmem:[#allocation7 + $0x1a] sm:$0x3] %vm765_vm8, %v760_v6 }
 0x125   :  { %v731_v19 = vunpack.c.0.s8 %v716_v22  ;;  %v732_v52 = vunpack.c.1.s8 %v716_v22 }
 0x126   :  { %v923_v60 = vadd.s32 %v922_v5, %v919_v16 }
 0x127   :  { %v761_v28 = vpack.c.b16 %v731_v19, %v731_v19  ;;  %v763_v30 = vpack.c.b16 %v732_v52, %v732_v52 }
 0x128   :  { %v925_v45 = vshrl.u32 %v923_v60, 16  ;;  %v924_v47 = vand.u32 65535, %v923_v60 }
 0x129   :  { %v762_v36 = vpack.c.b8 %v761_v28, %v761_v28  ;;  %v764_v59 = vpack.c.b8 %v763_v30, %v763_v30 }
 0x12a   :  { %v927_v0 = vcvt.s32.f32 %v925_v45  ;;  %v926_v53 = vcvt.s32.f32 %v924_v47 }
 0x12b   :  { %780 = vst.msk [vmem:[#allocation7 + $0x1c] sm:$0x3] %vm765_vm8, %v762_v36  ;;  %781 = vst.msk [vmem:[#allocation7 + $0x1e] sm:$0x3] %vm765_vm8, %v764_v59 }
 0x12c   :  { %930 = vadd.xlane.f32.xlu0 %v927_v0  ;;  %928 = vadd.xlane.f32.xlu1 %v926_v53 }
 0x12d   :  { %1043 = shalt.err (!%p1040_p0)
}
 0x12e   :  { %s1090_s29 = smov 32   ;;  %s1091_s30 = smov 2  }
 0x12f   :  { %956 = dma.vmem_to_hbm [thread:$0]  %s951_s27, 512, %s1818_s2, [#allocation4], %s1090_s29, %s1090_s29, %s1091_s30  }
 0x130   :  { %s1092_s6 = smov [#allocation8]  }
 0x131   :  { %s963_s7 = sshll.u32 %s1092_s6, 4  ;;  %s964_s7 = int_to_ptr.vmem [resolvable:$true] %s963_s7 }
 0x132   :  { %s1052_s2 = scalar_lea.vmem %s964_s7, 128  ;;  %p1057_p2 = scmp.lt.s32.totalorder %s964_s7, %s964_s7 }
 0x133   :  { %p1053_p1 = scmp.ne.s32.totalorder %s964_s7, %s1052_s2  ;;  %p1058_p3 = scmp.lt.s32.totalorder %s1052_s2, %s1052_s2 }
 0x135   :  { %p1059_p4 = por %p1058_p3, %p1057_p2 }
 0x137   :  { %p1060_p5 = pnand %p1059_p4, %p1053_p1 }
 0x1b5   :  { %v931_v18 = vpop.xlane.xlu0 %930  ;;  %v929_v27 = vpop.xlane.xlu1 %928 }
 0x1b6   :  { %v933_v37 = vcvt.f32.s32 %v931_v18  ;;  %v932_v50 = vcvt.f32.s32 %v929_v27 }
 0x1b8   :  { %v934_v7 = vshll.u32 %v933_v37, 16 }
 0x1ba   :  { %v935_v35 = vadd.s32 %v934_v7, %v932_v50 }
 0x1bc   :  { %v936_v11 = vrot.slane %v935_v35, 4 }
 0x1be   :  { %v937_v39 = vadd.s32 %v936_v11, %v935_v35 }
 0x1c0   :  { %v938_v20 = vrot.slane %v937_v39, 2 }
 0x1c2   :  { %v939_v48 = vadd.s32 %v938_v20, %v937_v39 }
 0x1c4   :  { %v940_v24 = vrot.slane %v939_v48, 1 }
 0x1c6   :  { %v941_v21 = vadd.s32 %v940_v24, %v939_v48 }
 0x1c8   :  { %977 = vpush %v941_v21 }
 0x1f9   :  { %s978_s8 = spop %977 }
 0x1fa   :  { %v943_v38 = vstv %s978_s8 }
 0x1fb   :  { %944 = vst [vmem:[#allocation8] sm:$0xff] %v943_v38 }
 0x1fc   :  { %1063 = shalt.err (!%p1060_p5)
}
 0x1fd   :  { %966 = dma.vmem_to_hbm [thread:$0]  %s964_s7, 128, %s1819_s3, [#allocation9]  }
 0x1fe   :  { %1076 = dma.done.wait [#allocation4], 512  }
 0x1ff   :  { %1077 = vsyncadd [#allocation4], 4294966784 }
 0x200   :  { %1078 = dma.done.wait [#allocation9], 128  }
 0x201   :  { %1079 = vsyncadd [#allocation9], 4294967168 }
 0x202   :  { %973 = vsyncpa [#allocation3], 1 }
 0x203   :  { %974 = vsyncpa [#allocation6], 1 }
 0x204   :  { %975 = vsyncpa [#allocation4], 1 }
 0x205   :  { %976 = vsyncpa [#allocation9], 1 }

</bundles_post_ra>
